<compile_context>
chip_gen: v7x
topology: tpu7x:2x2x1
jax: 0.10.0
libtpu: 0.0.40
codegen_flags: <defaults>
</compile_context>

<pallas_src>
import jax
import jax.numpy as jnp
from jax.experimental import pallas as pl
from jax.experimental.pallas import tpu as pltpu

EPS = 1e-12


def _round_up(x, m):
    return ((x + m - 1) // m) * m


def _self_output_kernel(h_ref, inp_ref, w_ref, p_ref, o_ref):
    # h_ref:   (tm, H)  hidden_states tile (native dtype)
    # inp_ref: (tm, H)  residual input tile
    # w_ref:   (H, H)   dense weight, (in, out) layout (pre-transposed once)
    # p_ref:   (3, H)   [dense bias; LN gamma; LN beta] (f32)
    # o_ref:   (tm, H)  output tile

    # MXU matmul with f32 accumulation. Activations are cast to the weight
    # dtype so a bf16 weight (recommended on v5e) gives single-pass bf16 MXU
    # work and halves weight DMA; accumulation stays f32.
    y = jnp.dot(h_ref[...].astype(w_ref.dtype), w_ref[...],
                preferred_element_type=jnp.float32)

    p = p_ref[...].astype(jnp.float32)
    bias, gamma, beta = p[0:1, :], p[1:2, :], p[2:3, :]

    # Dropout: inference mode -> identity.
    # TODO(synk): training-mode dropout (stateful PRNG mask) not implemented.

    # Bias folded into the residual add; epilogue in f32.
    x = y + inp_ref[...].astype(jnp.float32) + bias

    # TF-style LayerNorm over the last axis (eps inside the sqrt).
    u = jnp.mean(x, axis=-1, keepdims=True)
    d = x - u
    s = jnp.mean(d * d, axis=-1, keepdims=True)
    xn = d * jax.lax.rsqrt(s + EPS)              # rsqrt -> EUP, not VPU divide

    o_ref[...] = (gamma * xn + beta).astype(o_ref.dtype)


def prepare_self_output_params(w, b, gamma, beta, *, mxu_dtype=None):
    """One-time parameter preparation (call at parameter-load time, NOT per step).

    w: [H, H] in PyTorch nn.Linear (out, in) layout.
    Returns (w_t, params): w_t in (in, out) layout (optionally cast to
    mxu_dtype, e.g. jnp.bfloat16 for v5e), params = stacked [bias; gamma; beta]
    in f32 with shape (3, H).
    """
    w_t = w.T
    if mxu_dtype is not None:
        w_t = w_t.astype(mxu_dtype)
    params = jnp.stack([b.astype(jnp.float32),
                        gamma.astype(jnp.float32),
                        beta.astype(jnp.float32)], axis=0)        # (3, H)
    return w_t, params


def self_output(hidden_states, input_tensor, w_t, params, *, tm=512,
                vmem_limit_bytes=None):
    """Fused dense + bias + residual + TF-LayerNorm (BERT SelfOutput, eval).

    hidden_states, input_tensor: [..., H] (leading dims are flattened to rows,
    a free reshape). w_t: [H, H] in (in, out) layout and params: [3, H], both
    from prepare_self_output_params(). Returns hidden_states.shape/dtype.
    """
    orig_shape = hidden_states.shape
    H = orig_shape[-1]
    hs = hidden_states.reshape(-1, H)
    it = input_tensor.reshape(-1, H)
    M = hs.shape[0]
    assert it.shape == (M, H)
    assert w_t.shape == (H, H)
    assert params.shape == (3, H)

    # Row tile: multiple of 8 sublanes, never larger than the row count, and
    # clamped so the (parallel) grid has >= 2 steps whenever M allows it —
    # a 1-step grid would leave v7x's second TensorCore idle.
    tm = _round_up(max(8, min(tm, _round_up(M, 8))), 8)
    if M > 8 and pl.cdiv(M, tm) < 2:
        tm = _round_up(pl.cdiv(M, 2), 8)
    grid = (pl.cdiv(M, tm),)      # partial last block: Pallas clips it (no pad)

    io_itemsize = jnp.dtype(hs.dtype).itemsize
    bytes_accessed = (3 * M * H * io_itemsize                     # h, inp, out
                      + H * H * jnp.dtype(w_t.dtype).itemsize     # weight once
                      + 3 * H * 4)                                # params
    cost = pl.CostEstimate(flops=2 * M * H * H,
                           transcendentals=M,
                           bytes_accessed=bytes_accessed)

    out = pl.pallas_call(
        _self_output_kernel,
        out_shape=jax.ShapeDtypeStruct((M, H), hs.dtype),
        grid_spec=pltpu.PrefetchScalarGridSpec(
            num_scalar_prefetch=0,
            grid=grid,
            in_specs=[
                pl.BlockSpec((tm, H), lambda i: (i, 0)),   # hidden_states tile
                pl.BlockSpec((tm, H), lambda i: (i, 0)),   # residual tile
                # Grid-invariant operands: constant index_map, so the DMA is
                # issued once and the data stays resident across all row tiles.
                # TODO(synk): single-buffer (pipeline_mode=pl.Buffered(1)) to
                # reclaim the idle second buffer when H is very large.
                pl.BlockSpec((H, H), lambda i: (0, 0)),    # weight (in, out)
                pl.BlockSpec((3, H), lambda i: (0, 0)),    # bias/gamma/beta
            ],
            out_specs=pl.BlockSpec((tm, H), lambda i: (i, 0)),
        ),
        compiler_params=pltpu.CompilerParams(
            dimension_semantics=("parallel",),
            vmem_limit_bytes=vmem_limit_bytes),
        cost_estimate=cost,
    )(hs, it, w_t, params)

    return out.reshape(orig_shape)


def self_output_ref(hidden_states, input_tensor, w, b, gamma, beta):
    """Pure-JAX f32 reference mirroring the PyTorch module (dropout in eval).
    Takes w in the original PyTorch (out, in) layout."""
    h = hidden_states.astype(jnp.float32) @ w.T.astype(jnp.float32)
    h = h + b.astype(jnp.float32)
    x = h + input_tensor.astype(jnp.float32)
    u = jnp.mean(x, axis=-1, keepdims=True)
    s = jnp.mean((x - u) ** 2, axis=-1, keepdims=True)
    xn = (x - u) / jnp.sqrt(s + EPS)
    return gamma.astype(jnp.float32) * xn + beta.astype(jnp.float32)


if __name__ == "__main__":
    key = jax.random.PRNGKey(0)
    k1, k2, k3, k4 = jax.random.split(key, 4)

    hidden = 128                                   # lane-aligned hidden size
    bound = 1.0 / (hidden ** 0.5)
    w = jax.random.uniform(k3, (hidden, hidden), minval=-bound, maxval=bound,
                           dtype=jnp.float32)      # PyTorch (out, in) layout
    b = jax.random.uniform(k4, (hidden,), minval=-bound, maxval=bound,
                           dtype=jnp.float32)
    gamma = jnp.ones((hidden,), dtype=jnp.float32)
    beta = jnp.zeros((hidden,), dtype=jnp.float32)

    # --- test 1: f32 I/O, [B, S, H] input, 2-step parallel grid ---
    batch, seq = 2, 128                            # M = 256 -> two 128-row tiles
    hs = jax.random.normal(k1, (batch, seq, hidden), dtype=jnp.float32)
    it = jax.random.normal(k2, (batch, seq, hidden), dtype=jnp.float32)

    w_t, params = prepare_self_output_params(w, b, gamma, beta)   # one-time
    out = jax.block_until_ready(self_output(hs, it, w_t, params))
    ref = self_output_ref(hs, it, w, b, gamma, beta)
    assert out.shape == hs.shape
    assert jnp.allclose(out.astype(jnp.float32), ref, atol=5e-2, rtol=5e-2), \
        "f32 mismatch vs reference"

    # --- test 2: bf16 I/O + bf16 weight, non-tile-multiple rows
    #             (partial last block, no padding / slicing copies) ---
    batch2, seq2 = 2, 100                          # M = 200 -> tiles of 104 + 96
    hs_b = jax.random.normal(k1, (batch2, seq2, hidden),
                             dtype=jnp.float32).astype(jnp.bfloat16)
    it_b = jax.random.normal(k2, (batch2, seq2, hidden),
                             dtype=jnp.float32).astype(jnp.bfloat16)
    w_t_b, params_b = prepare_self_output_params(w, b, gamma, beta,
                                                 mxu_dtype=jnp.bfloat16)
    out_b = jax.block_until_ready(self_output(hs_b, it_b, w_t_b, params_b))
    ref_b = self_output_ref(hs_b, it_b, w.astype(jnp.bfloat16), b, gamma, beta)
    assert out_b.shape == hs_b.shape
    assert out_b.dtype == jnp.bfloat16
    assert jnp.allclose(out_b.astype(jnp.float32), ref_b, atol=8e-2, rtol=8e-2), \
        "bf16 mismatch vs reference"

    print("KERNEL_OK")
</pallas_src>

<mosaic_0001>
module attributes {stable_mosaic.version = 11 : i64} {
  func.func @_self_output_kernel(%arg0: i32, %arg1: memref<128x128xf32, #tpu.memory_space<vmem>>, %arg2: memref<128x128xf32, #tpu.memory_space<vmem>>, %arg3: memref<128x128xf32, #tpu.memory_space<vmem>>, %arg4: memref<3x128xf32, #tpu.memory_space<vmem>>, %arg5: memref<128x128xf32, #tpu.memory_space<vmem>>) attributes {dimension_semantics = [#tpu.dimension_semantics<parallel>], iteration_bounds = array<i64: 2>, scalar_prefetch = 0 : i64, scratch_operands = 0 : i64, tpu.core_type = #tpu.core_type<tc>, window_params = [{transform_indices = @transform_0, window_bounds = array<i64: 128, 128>}, {transform_indices = @transform_1, window_bounds = array<i64: 128, 128>}, {pipeline_mode = #tpu.pipeline_mode<synchronous>, transform_indices = @transform_2, window_bounds = array<i64: 128, 128>}, {pipeline_mode = #tpu.pipeline_mode<synchronous>, transform_indices = @transform_3, window_bounds = array<i64: 3, 128>}, {transform_indices = @transform_4, window_bounds = array<i64: 128, 128>}]} {
    %c0 = arith.constant 0 : index
    %c0_0 = arith.constant 0 : index
    %0 = vector.load %arg1[%c0, %c0_0] : memref<128x128xf32, #tpu.memory_space<vmem>>, vector<128x128xf32>
    %c0_1 = arith.constant 0 : index
    %c0_2 = arith.constant 0 : index
    %1 = vector.load %arg3[%c0_1, %c0_2] : memref<128x128xf32, #tpu.memory_space<vmem>>, vector<128x128xf32>
    %cst = arith.constant dense<0.000000e+00> : vector<128x128xf32>
    %2 = tpu.matmul %0, %1, %cst {dimension_numbers = #tpu.dot_dimension_numbers<[1], [0], [0], [1], [0, 0, 1, 1], [], []>} : vector<128x128xf32>, vector<128x128xf32>, vector<128x128xf32> -> vector<128x128xf32>
    %c0_3 = arith.constant 0 : index
    %c0_4 = arith.constant 0 : index
    %3 = vector.load %arg4[%c0_3, %c0_4] : memref<3x128xf32, #tpu.memory_space<vmem>>, vector<3x128xf32>
    %4 = vector.extract_strided_slice %3 {offsets = [0, 0], sizes = [1, 128], strides = [1, 1]} : vector<3x128xf32> to vector<1x128xf32>
    %5 = vector.extract_strided_slice %3 {offsets = [1, 0], sizes = [1, 128], strides = [1, 1]} : vector<3x128xf32> to vector<1x128xf32>
    %6 = vector.extract_strided_slice %3 {offsets = [2, 0], sizes = [1, 128], strides = [1, 1]} : vector<3x128xf32> to vector<1x128xf32>
    %c0_5 = arith.constant 0 : index
    %c0_6 = arith.constant 0 : index
    %7 = vector.load %arg2[%c0_5, %c0_6] : memref<128x128xf32, #tpu.memory_space<vmem>>, vector<128x128xf32>
    %8 = arith.addf %2, %7 : vector<128x128xf32>
    %9 = vector.broadcast %4 : vector<1x128xf32> to vector<128x128xf32>
    %10 = arith.addf %8, %9 : vector<128x128xf32>
    %cst_7 = arith.constant dense<0.000000e+00> : vector<128xf32>
    %11 = vector.multi_reduction <add>, %10, %cst_7 [1] : vector<128x128xf32> to vector<128xf32>
    %12 = vector.shape_cast %11 : vector<128xf32> to vector<128x1xf32>
    %cst_8 = arith.constant 1.280000e+02 : f32
    %13 = vector.broadcast %cst_8 : f32 to vector<128x1xf32>
    %14 = arith.divf %12, %13 : vector<128x1xf32>
    %15 = vector.broadcast %14 : vector<128x1xf32> to vector<128x128xf32>
    %16 = arith.subf %10, %15 : vector<128x128xf32>
    %17 = arith.mulf %16, %16 : vector<128x128xf32>
    %cst_9 = arith.constant dense<0.000000e+00> : vector<128xf32>
    %18 = vector.multi_reduction <add>, %17, %cst_9 [1] : vector<128x128xf32> to vector<128xf32>
    %19 = vector.shape_cast %18 : vector<128xf32> to vector<128x1xf32>
    %cst_10 = arith.constant 1.280000e+02 : f32
    %20 = vector.broadcast %cst_10 : f32 to vector<128x1xf32>
    %21 = arith.divf %19, %20 : vector<128x1xf32>
    %cst_11 = arith.constant 9.99999996E-13 : f32
    %22 = vector.broadcast %cst_11 : f32 to vector<128x1xf32>
    %23 = arith.addf %21, %22 : vector<128x1xf32>
    %24 = math.rsqrt %23 : vector<128x1xf32>
    %25 = vector.broadcast %24 : vector<128x1xf32> to vector<128x128xf32>
    %26 = arith.mulf %16, %25 : vector<128x128xf32>
    %27 = vector.broadcast %5 : vector<1x128xf32> to vector<128x128xf32>
    %28 = arith.mulf %27, %26 : vector<128x128xf32>
    %29 = vector.broadcast %6 : vector<1x128xf32> to vector<128x128xf32>
    %30 = arith.addf %28, %29 : vector<128x128xf32>
    %c0_12 = arith.constant 0 : index
    %c0_13 = arith.constant 0 : index
    %31 = vector.load %arg5[%c0_12, %c0_13] : memref<128x128xf32, #tpu.memory_space<vmem>>, vector<128x128xf32>
    tpu.vector_store %arg5[%c0_12, %c0_13], %30 {strides = array<i32>} : memref<128x128xf32, #tpu.memory_space<vmem>>, vector<128x128xf32>,
    return
  }
  func.func @transform_0(%arg0: i32) -> (i32, i32) {
    %c0_i32 = arith.constant 0 : i32
    %c0_i32_0 = arith.constant 0 : i32
    return %arg0, %c0_i32 : i32, i32
  }
  func.func @transform_1(%arg0: i32) -> (i32, i32) {
    %c0_i32 = arith.constant 0 : i32
    %c0_i32_0 = arith.constant 0 : i32
    return %arg0, %c0_i32 : i32, i32
  }
  func.func @transform_2(%arg0: i32) -> (i32, i32) {
    %c0_i32 = arith.constant 0 : i32
    %c0_i32_0 = arith.constant 0 : i32
    %c0_i32_1 = arith.constant 0 : i32
    return %c0_i32, %c0_i32_0 : i32, i32
  }
  func.func @transform_3(%arg0: i32) -> (i32, i32) {
    %c0_i32 = arith.constant 0 : i32
    %c0_i32_0 = arith.constant 0 : i32
    %c0_i32_1 = arith.constant 0 : i32
    return %c0_i32, %c0_i32_0 : i32, i32
  }
  func.func @transform_4(%arg0: i32) -> (i32, i32) {
    %c0_i32 = arith.constant 0 : i32
    %c0_i32_0 = arith.constant 0 : i32
    return %arg0, %c0_i32 : i32, i32
  }
}

</mosaic_0001>

<bundles_post_ra>
// kernel: tpu_custom_call.1
= control target key start
LH: loop header
LB: loop body
LE: loop exit
PB: predicated region body
PF: predicated region fallthrough
CT: control target
= control target key end

     0   :  { %s1795_s0 = inlined_call_operand.hbm [shape: f32[256,128], index: 0, kind: input, shape index: {}]   ;;  %s1796_s1 = inlined_call_operand.hbm [shape: f32[256,128], index: 1, kind: input, shape index: {}]   ;;  %s1797_s2 = inlined_call_operand.hbm [shape: f32[128,128], index: 2, kind: input, shape index: {}]   ;;  %s1798_s3 = inlined_call_operand.vmem [shape: f32[3,128], index: 3, kind: input, shape index: {}]   ;;  %s1799_s4 = inlined_call_operand.hbm [shape: f32[256,128], index: 4, kind: output, shape index: {}]  }
   0x1   :  { %1807 = sst [smem:[#allocation14_spill]] %s1795_s0 }
   0x2   :  { %1808 = sst [smem:[#allocation15_spill]] %s1797_s2 }
   0x3   :  { %9 = vsyncpa [#allocation3], 0 }
   0x4   :  { %11 = vsyncpa [#allocation3 + $0x1], 0 }
   0x5   :  { %12 = vsyncpa [#allocation6], 0 }
   0x6   :  { %14 = vsyncpa [#allocation6 + $0x1], 0 }
   0x7   :  { %15 = vsyncpa [#allocation4], 0 }
   0x8   :  { %17 = vsyncpa [#allocation4 + $0x1], 0  ;;  %s1293_s15 = smov 0   ;;  %s1295_s16 = smov 0  }
   0x9   :  { %s1297_s17 = smov 0   ;;  %s1299_s18 = smov 0  }
   0xa LB: > { %s1314_s19 = sadd.s32 4294967295, %s1258_s18   ;;  %s839_s20 = sadd.s32 4294967294, %s1258_s18   ;;  %s1258_s18 = sphi %s1299_s18, %s1831_s18   ;;  %s1254_s17 = sphi %s1297_s17, %s1830_s17   ;;  %s1250_s16 = sphi %s1295_s16, %s1829_s16   ;;  %s1246_s15 = sphi %s1293_s15, %s1828_s15  }
   0xb   : > { %p43_p0 = scmp.ne.s32.totalorder %s1250_s16, %s1246_s15  ;;  %p1800_p1 = scmp.eq.s32.totalorder %s1314_s19, 0 }
   0xc   : > { %p141_p3 = scmp.eq.s32.totalorder %s839_s20, 1  ;;  %p840_p5 = scmp.ge.s32.totalorder %s1258_s18, 1 }
   0xd   : > { %p1323_p4 = por %p1800_p1, %p43_p0  ;;  %p148_p7 = scmp.lt.s32.totalorder %s1258_s18, 3 }
   0xe   : > { %p1328_p6 = por %p141_p3, %p43_p0  ;;  %s1260_s24 = smov [#allocation7]  }
   0xf   : > { %s1809_s21 = scalar_select %p1323_p4, 1, 0 }
  0x10   : > { %s1810_s22 = scalar_select %p1328_p6, 1, 0 }
  0x11   : > { %p1333_p8 = pnand %p840_p5, %p148_p7  ;;  %s160_s25 = sshll.u32 %s1260_s24, 4  ;;  %s1337_s25 = int_to_ptr.vmem [resolvable:$true] %s160_s25 }
  0x12   : > { %s1349_s27 = sadd.s32 1, %s1258_s18   ;;  %s30_s28 = sadd.s32 1, %s1254_s17 }
  0x13   : > { %s1811_s23 = scalar_select %p1333_p8, 1, 0 }
  0x14   : > { %p1008_p9 = pneg %p1333_p8  ;;  %s27_s29 = ssub.s32 %s1258_s18, %s1349_s27 }
  0x15   : > { %s1813_s2 = sld [smem:[#allocation15_spill]] }
  0x16   : > { %p1344_p11 = pnand %p1008_p9, %p1800_p1 }
  0x18   : > { %p1098_p13 = pneg %p1344_p11 }
  0x1b   : > { %s1096_s6 = scalar_lea.hbm %s1813_s2, 2048 }
  0x1c   : > { %p1097_p12 = scmp.ne.s32.totalorder %s1813_s2, %s1096_s6  ;;  %p1103_p5 = scmp.lt.u32.totalorder %s1096_s6, %s1813_s2 }
  0x1e   : > { %p1099_p0 = pnand %p1098_p13, %p1097_p12 }
  0x20   : > { %p1100_p3 = pneg %p1099_p0 }
  0x22   : > { %p1105_p7 = pnand %p1103_p5, %p1100_p3 }
  0x24   : > { %1108 = shalt.err (!%p1105_p7)
}
  0x25   : > { %s1109_s11 = scalar_lea.vmem %s1337_s25, 2048  ;;  %p1117_p2 = scmp.lt.s32.totalorder %s1337_s25, %s1337_s25 }
  0x26   : > { %p1110_p9 = scmp.ne.s32.totalorder %s1337_s25, %s1109_s11  ;;  %p1118_p6 = scmp.lt.s32.totalorder %s1109_s11, %s1109_s11 }
  0x28   : > { %p1112_p10 = pnand %p1110_p9, %p1098_p13  ;;  %p1119_p4 = por %p1118_p6, %p1117_p2 }
  0x2a   : > { %p1113_p1 = pneg %p1112_p10 }
  0x2c   : > { %p1120_p8 = pnand %p1119_p4, %p1113_p1 }
  0x2e   : > { %1123 = shalt.err (!%p1120_p8)
}
  0x2f   : > { %s1803_s12 = smov 128   ;;  %s1805_s13 = smov 8  }
  0x30   : > { %1011 = dma.hbm_to_vmem [thread:$0]  (!%p1344_p11), %s1813_s2, 2048, %s1337_s25, [#allocation6], %s1803_s12, %s1803_s12, %s1805_s13  }
  0x31   : > { %p28_p1 = scmp.eq.s32.totalorder %s27_s29, 0  ;;  %p37_p2 = scmp.ne.s32.totalorder %s1254_s17, %s1250_s16 }
  0x32   : > { %p38_p4 = scmp.eq.s32.totalorder %s1258_s18, 0  ;;  %p1024_p6 = scmp.lt.s32.totalorder %s1258_s18, 2 }
  0x33   : > { %s1383_s24 = scalar_select %p28_p1, %s1254_s17, %s30_s28  }
  0x34   : > { %p39_p8 = por %p38_p4, %p37_p2  ;;  %p1815_p10 = scmp.eq.s32.totalorder %s1314_s19, 1 }
  0x35   : > { %1814 = sst [smem:[#allocation13_spill]] %s1383_s24  ;;  %s177_s26 = sand.u32 1, %s1254_s17  }
  0x36   : > { %p1387_p12 = por %p1815_p10, %p37_p2  ;;  %s859_s5 = sshll.u32 %s1258_s18, 11 }
  0x37   : > { %s1393_s6 = sshll.u32 %s177_s26, 7  ;;  %s1817_s0 = sld [smem:[#allocation14_spill]] }
  0x38   : > { %s181_s28 = scalar_lea.vmem [#allocation2], %s1393_s6  ;;  %p1401_p11 = pnand %p1024_p6, %p39_p8 }
  0x39   : > { %s188_s29 = sshll.u32 %s181_s28, 4  ;;  %s1410_s14 = scalar_lea.hbm %s1796_s1, %s859_s5  ;;  %s1405_s29 = int_to_ptr.vmem [resolvable:$true] %s188_s29 }
  0x3a   : > { %s1412_s20 = scalar_lea.sflag [#allocation3], %s177_s26  ;;  %p1126_p0 = pneg %p1401_p11 }
  0x3d   : > { %s1398_s25 = scalar_lea.hbm %s1817_s0, %s859_s5  ;;  %s1129_s12 = scalar_lea.hbm %s1817_s0, 4096 }
  0x3e   : > { %s1124_s7 = scalar_lea.hbm %s1398_s25, 2048  ;;  %p1130_p7 = scmp.lt.u32.totalorder %s1398_s25, %s1817_s0 }
  0x3f   : > { %p1125_p13 = scmp.ne.s32.totalorder %s1398_s25, %s1124_s7  ;;  %p1131_p9 = scmp.lt.u32.totalorder %s1129_s12, %s1124_s7 }
  0x40   : > { %p1133_p2 = scmp.lt.u32.totalorder %s1124_s7, %s1398_s25 }
  0x41   : > { %p1127_p3 = pnand %p1126_p0, %p1125_p13  ;;  %p1132_p1 = por %p1131_p9, %p1130_p7 }
  0x43   : > { %p1128_p5 = pneg %p1127_p3  ;;  %p1134_p4 = por %p1133_p2, %p1132_p1 }
  0x45   : > { %p1135_p6 = pnand %p1134_p4, %p1128_p5 }
  0x47   : > { %1138 = shalt.err (!%p1135_p6)
}
  0x48   : > { %s1139_s26 = scalar_lea.vmem %s1405_s29, 2048  ;;  %s1263_s5 = smov [#allocation2]  }
  0x49   : > { %p1140_p8 = scmp.ne.s32.totalorder %s1405_s29, %s1139_s26  ;;  %s1144_s10 = sshll.u32 %s1263_s5, 4  ;;  %s1145_s10 = int_to_ptr.vmem [resolvable:$false] %s1144_s10 }
  0x4a   : > { %s1146_s2 = scalar_lea.vmem %s1145_s10, 4096  ;;  %p1147_p3 = scmp.lt.s32.totalorder %s1405_s29, %s1145_s10 }
  0x4b   : > { %p1142_p10 = pnand %p1140_p8, %p1126_p0  ;;  %p1148_p7 = scmp.lt.s32.totalorder %s1146_s2, %s1139_s26 }
  0x4d   : > { %p1143_p13 = pneg %p1142_p10  ;;  %p1149_p9 = por %p1148_p7, %p1147_p3 }
  0x4f   : > { %p1150_p1 = pnand %p1149_p9, %p1143_p13 }
  0x51   : > { %1153 = shalt.err (!%p1150_p1)
}
  0x52   : > { %s1819_s12 = smov 8   ;;  %s1820_s13 = smov 128  }
  0x53   : > { %1015 = dma.hbm_to_vmem [thread:$0]  (!%p1401_p11), %s1398_s25, 2048, %s1405_s29, %s1412_s20, %s1820_s13, %s1820_s13, %s1819_s12  }
  0x54   : > { %s202_s11 = scalar_lea.vmem [#allocation5], %s1393_s6  ;;  %s198_s8 = sand.u32 1, %s1258_s18  }
  0x55   : > { %s209_s7 = sshll.u32 %s202_s11, 4  ;;  %s1447_s28 = scalar_lea.sflag [#allocation6], %s198_s8  ;;  %s1445_s7 = int_to_ptr.vmem [resolvable:$true] %s209_s7 }
  0x56   : > { %s1154_s26 = scalar_lea.hbm %s1410_s14, 2048  ;;  %s1159_s2 = scalar_lea.hbm %s1796_s1, 4096 }
  0x57   : > { %p1155_p5 = scmp.ne.s32.totalorder %s1410_s14, %s1154_s26  ;;  %p1160_p6 = scmp.lt.u32.totalorder %s1410_s14, %s1796_s1 }
  0x58   : > { %p1161_p8 = scmp.lt.u32.totalorder %s1159_s2, %s1154_s26  ;;  %p1163_p13 = scmp.lt.u32.totalorder %s1154_s26, %s1410_s14 }
  0x59   : > { %p1157_p2 = pnand %p1155_p5, %p1126_p0 }
  0x5a   : > { %p1162_p10 = por %p1161_p8, %p1160_p6 }
  0x5b   : > { %p1158_p4 = pneg %p1157_p2 }
  0x5c   : > { %p1164_p3 = por %p1163_p13, %p1162_p10 }
  0x5e   : > { %p1165_p7 = pnand %p1164_p3, %p1158_p4 }
  0x60   : > { %1168 = shalt.err (!%p1165_p7)
}
  0x61   : > { %s1169_s6 = scalar_lea.vmem %s1445_s7, 2048  ;;  %s1264_s25 = smov [#allocation5]  }
  0x62   : > { %p1170_p9 = scmp.ne.s32.totalorder %s1445_s7, %s1169_s6  ;;  %s1174_s29 = sshll.u32 %s1264_s25, 4  ;;  %s1175_s29 = int_to_ptr.vmem [resolvable:$false] %s1174_s29 }
  0x63   : > { %s1176_s0 = scalar_lea.vmem %s1175_s29, 4096  ;;  %p1177_p2 = scmp.lt.s32.totalorder %s1445_s7, %s1175_s29 }
  0x64   : > { %p1172_p1 = pnand %p1170_p9, %p1126_p0  ;;  %p1178_p6 = scmp.lt.s32.totalorder %s1176_s0, %s1169_s6 }
  0x66   : > { %p1173_p5 = pneg %p1172_p1  ;;  %p1179_p8 = por %p1178_p6, %p1177_p2 }
  0x68   : > { %p1180_p10 = pnand %p1179_p8, %p1173_p5 }
  0x6a   : > { %1183 = shalt.err (!%p1180_p10)
}
  0x6b   : > { %1018 = dma.hbm_to_vmem [thread:$0]  (!%p1401_p11), %s1410_s14, 2048, %s1445_s7, %s1447_s28, %s1820_s13, %s1820_s13, %s1819_s12  }
  0x6c   : > { %p1821_p0 = scmp.ne.s32.totalorder %s1811_s23, 0 }
  0x6d   : > { %s1479_s24 = sand.u32 (!%p1821_p0), 1, %s1250_s16   ;;  %p1822_p4 = scmp.ne.s32.totalorder (!%p1821_p0), %s1809_s21, 0 }
  0x6e   : > { %221 = sbr.rel (%p1821_p0) target bundleno = 734 (0x2de), region = 36  ;;  %s1482_s20 = sshll.u32 (!%p1821_p0), %s1479_s24, 7 }
  0x6f   : > { %s224_s9 = scalar_lea.sflag (!%p1821_p0), [#allocation3], %s1479_s24  ;;  %s1486_s11 = scalar_lea.vmem (!%p1821_p0), [#allocation2], %s1482_s20 }
  0x75   : > { %1229 = dma.done.wait (%p1822_p4), %s224_s9, 2048  }
  0x76   : > { %1231 = vsyncadd (%p1822_p4), %s224_s9, 4294965248  ;;  %s232_s23 = sand.u32 1, %s1314_s19   ;;  %s1494_s12 = scalar_lea.vmem [#allocation5], %s1482_s20 }
  0x77   : > { %s233_s14 = scalar_lea.sflag [#allocation6], %s232_s23 }
  0x78   : > { %1233 = dma.done.wait (%p1822_p4), %s233_s14, 2048  }
  0x79   : > { %1235 = vsyncadd (%p1822_p4), %s233_s14, 4294965248  ;;  %p1823_p11 = scmp.eq.s32.totalorder %s1314_s19, 0 }
  0x7b   : > { %1237 = dma.done.wait (%p1823_p11), [#allocation6], 2048   ;;  %p1824_p13 = pmov %p1823_p11 }
  0x7c   : > { %v289_v0 = vld [vmem:[#allocation7] sm:$0xff]  ;;  %v290_v1 = vld [vmem:[#allocation7 + $0x8] sm:$0xff]  ;;  %v291_v2 = vld [vmem:[#allocation7 + $0x10] sm:$0xff]  ;;  %v467_v40 = vlaneseq  ;;  %s1683_s7 = scalar_lea.vmem [#allocation8], %s1482_s20  ;;  %s861_s8 = sshll.u32 %s1314_s19, 11 }
  0x7d   : > { %1239 = vsyncadd (%p1824_p13), [#allocation6], 4294965248  ;;  %v950_v3 = vpack.c.bf16 %v290_v1, %v289_v0  ;;  %v292_v4 = vld [vmem:[#allocation7 + $0x18] sm:$0xff]  ;;  %v293_v6 = vld [vmem:[#allocation7 + $0x20] sm:$0xff]  ;;  %s734_s28 = sshll.u32 %s1683_s7, 4  ;;  %s1747_s10 = scalar_lea.hbm %s1799_s4, %s861_s8  ;;  %s1749_s28 = int_to_ptr.vmem [resolvable:$true] %s734_s28 }
  0x7e   : > { %v954_v5 = vpack.c.bf16 %v292_v4, %v291_v2  ;;  %v294_v7 = vld [vmem:[#allocation7 + $0x28] sm:$0xff]  ;;  %v273_v9 = vld [vmem:[%s1486_s11] sm:$0xff]  ;;  %v295_v11 = vld [vmem:[#allocation7 + $0x30] sm:$0xff]  ;;  %v468_v41 = vshrl.u32 %v467_v40, 7  ;;  %s721_s19 = scalar_lea.sflag [#allocation4], %s1479_s24  ;;  %s1184_s2 = scalar_lea.vmem %s1749_s28, 2048 }
  0x7f   : > { %951 = vmatprep.subr.bf16.mxu0 %v950_v3  ;;  %982 = vmatprep.subr.bf16.mxu1 %v950_v3  ;;  %v958_v8 = vpack.c.bf16 %v294_v7, %v293_v6  ;;  %v281_v10 = vld [vmem:[%s1486_s11 + $0x40] sm:$0xff]  ;;  %v296_v12 = vld [vmem:[#allocation7 + $0x38] sm:$0xff]  ;;  %v298_v15 = vld [vmem:[#allocation7 + $0x48] sm:$0xff]  ;;  %p1185_p3 = scmp.ne.s32.totalorder %s1749_s28, %s1184_s2  ;;  %s1265_s6 = smov [#allocation8]  }
  0x80   : > { %953 = vmatpush3.bf16.msra.mxu0 %v950_v3  ;;  %990 = vmatpush3.bf16.msra.mxu1 %v950_v3  ;;  %v962_v13 = vpack.c.bf16 %v296_v12, %v295_v11  ;;  %v297_v14 = vld [vmem:[#allocation7 + $0x40] sm:$0xff]  ;;  %v299_v17 = vld [vmem:[#allocation7 + $0x50] sm:$0xff]  ;;  %v300_v18 = vld [vmem:[#allocation7 + $0x58] sm:$0xff]  ;;  %v666_v42 = vsub.s32 1, %v468_v41  ;;  %v686_v43 = vsub.s32 2, %v468_v41  ;;  %v469_v47 = vsub.s32 0, %v468_v41 }
  0x81   : > { %955 = vmatprep.subr.bf16.mxu0 %v954_v5  ;;  %983 = vmatprep.subr.bf16.mxu1 %v954_v5  ;;  %v966_v16 = vpack.c.bf16 %v298_v15, %v297_v14  ;;  %v970_v19 = vpack.c.bf16 %v300_v18, %v299_v17  ;;  %v301_v20 = vld [vmem:[#allocation7 + $0x60] sm:$0xff]  ;;  %v302_v21 = vld [vmem:[#allocation7 + $0x68] sm:$0xff]  ;;  %v303_v23 = vld [vmem:[#allocation7 + $0x70] sm:$0xff]  ;;  %p1186_p7 = pnand %p1185_p3, %p1387_p12  ;;  %s1188_s25 = sshll.u32 %s1265_s6, 4  ;;  %s1189_s25 = int_to_ptr.vmem [resolvable:$false] %s1188_s25 }
  0x82   : > { %926 = vmatprep.mubr.f32.mxu0 %v273_v9  ;;  %938 = vmatprep.mubr.f32.mxu1 %v281_v10  ;;  %v974_v22 = vpack.c.bf16 %v302_v21, %v301_v20  ;;  %v304_v24 = vld [vmem:[#allocation7 + $0x78] sm:$0xff]  ;;  %v274_v26 = vld [vmem:[%s1486_s11 + $0x8] sm:$0xff]  ;;  %v275_v28 = vld [vmem:[%s1486_s11 + $0x10] sm:$0xff]  ;;  %s1190_s29 = scalar_lea.vmem %s1189_s25, 4096  ;;  %p1191_p1 = scmp.lt.s32.totalorder %s1749_s28, %s1189_s25 }
  0x83   : > { %v978_v25 = vpack.c.bf16 %v304_v24, %v303_v23  ;;  %v282_v27 = vld [vmem:[%s1486_s11 + $0x48] sm:$0xff]  ;;  %v283_v29 = vld [vmem:[%s1486_s11 + $0x50] sm:$0xff]  ;;  %v276_v30 = vld [vmem:[%s1486_s11 + $0x18] sm:$0xff]  ;;  %p1187_p9 = pneg %p1186_p7  ;;  %p1192_p5 = scmp.lt.s32.totalorder %s1190_s29, %s1184_s2 }
  0x84   : > { %957 = vmatpush3.bf16.msra.mxu0 %v954_v5  ;;  %991 = vmatpush3.bf16.msra.mxu1 %v954_v5  ;;  %v284_v31 = vld [vmem:[%s1486_s11 + $0x58] sm:$0xff]  ;;  %v277_v32 = vld [vmem:[%s1486_s11 + $0x20] sm:$0xff]  ;;  %v278_v34 = vld [vmem:[%s1486_s11 + $0x28] sm:$0xff] }
  0x85   : > { %959 = vmatprep.subr.bf16.mxu0 %v958_v8  ;;  %984 = vmatprep.subr.bf16.mxu1 %v958_v8  ;;  %v285_v33 = vld [vmem:[%s1486_s11 + $0x60] sm:$0xff]  ;;  %v286_v35 = vld [vmem:[%s1486_s11 + $0x68] sm:$0xff]  ;;  %v279_v36 = vld [vmem:[%s1486_s11 + $0x30] sm:$0xff]  ;;  %p1193_p2 = por %p1192_p5, %p1191_p1 }
  0x86   : > { %v287_v37 = vld [vmem:[%s1486_s11 + $0x70] sm:$0xff]  ;;  %v280_v38 = vld [vmem:[%s1486_s11 + $0x38] sm:$0xff]  ;;  %v305_v44 = vld [vmem:[%s1798_s3] sm:$0x7] }
  0x87   : > { %v288_v39 = vld [vmem:[%s1486_s11 + $0x78] sm:$0xff]  ;;  %v1523_v45 = vrot.slane %v305_v44, %v666_v42  ;;  %v1525_v46 = vrot.slane %v305_v44, %v686_v43  ;;  %v307_v48 = vld [vmem:[%s1494_s12 + $0x8] sm:$0xff]  ;;  %v1529_v50 = vrot.slane %v305_v44, %v469_v47  ;;  %v306_v53 = vld [vmem:[%s1494_s12] sm:$0xff]  ;;  %p1194_p6 = pnand %p1193_p2, %p1187_p9 }
  0x88   : > { %961 = vmatpush3.bf16.msra.mxu0 %v958_v8  ;;  %992 = vmatpush3.bf16.msra.mxu1 %v958_v8  ;;  %v315_v49 = vld [vmem:[%s1494_s12 + $0x48] sm:$0xff]  ;;  %v309_v58 = vld [vmem:[%s1494_s12 + $0x18] sm:$0xff]  ;;  %v314_v63 = vld [vmem:[%s1494_s12 + $0x40] sm:$0xff] }
  0x89   : > { %963 = vmatprep.subr.bf16.mxu0 %v962_v13  ;;  %985 = vmatprep.subr.bf16.mxu1 %v962_v13  ;;  %v317_v59 = vld [vmem:[%s1494_s12 + $0x58] sm:$0xff]  ;;  %v308_v9 = vld [vmem:[%s1494_s12 + $0x10] sm:$0xff]  ;;  %v310_v17 = vld [vmem:[%s1494_s12 + $0x20] sm:$0xff] }
  0x8a   : > { %v316_v10 = vld [vmem:[%s1494_s12 + $0x50] sm:$0xff]  ;;  %v321_v41 = vld [vmem:[%s1494_s12 + $0x78] sm:$0xff] }
  0x8b   : > { %v320_v42 = vld [vmem:[%s1494_s12 + $0x70] sm:$0xff] }
  0x8c   : > { %965 = vmatpush3.bf16.msra.mxu0 %v962_v13  ;;  %993 = vmatpush3.bf16.msra.mxu1 %v962_v13 }
  0x8d   : > { %967 = vmatprep.subr.bf16.mxu0 %v966_v16  ;;  %986 = vmatprep.subr.bf16.mxu1 %v966_v16 }
  0x90   : > { %969 = vmatpush3.bf16.msra.mxu0 %v966_v16  ;;  %994 = vmatpush3.bf16.msra.mxu1 %v966_v16  ;;  %v311_v16 = vld [vmem:[%s1494_s12 + $0x28] sm:$0xff] }
  0x91   : > { %971 = vmatprep.subr.bf16.mxu0 %v970_v19  ;;  %987 = vmatprep.subr.bf16.mxu1 %v970_v19 }
  0x94   : > { %973 = vmatpush3.bf16.msra.mxu0 %v970_v19  ;;  %995 = vmatpush3.bf16.msra.mxu1 %v970_v19 }
  0x95   : > { %975 = vmatprep.subr.bf16.mxu0 %v974_v22  ;;  %988 = vmatprep.subr.bf16.mxu1 %v974_v22 }
  0x98   : > { %977 = vmatpush3.bf16.msra.mxu0 %v974_v22  ;;  %996 = vmatpush3.bf16.msra.mxu1 %v974_v22 }
  0x99   : > { %979 = vmatprep.subr.bf16.mxu0 %v978_v25  ;;  %989 = vmatprep.subr.bf16.mxu1 %v978_v25 }
  0x9c   : > { %981 = vmatpush3.bf16.msra.mxu0 %v978_v25  ;;  %997 = vmatpush3.bf16.msra.mxu1 %v978_v25  ;;  %v319_v25 = vld [vmem:[%s1494_s12 + $0x68] sm:$0xff] }
  0x9f   : > { %927 = vmatmul.mubr.f32.vlgmr.msra.gmra.mrb[0].mxu0 %v274_v26  ;;  %939 = vmatmul.mubr.f32.vlgmr.msra.gmra.mrb[0].mxu1 %v282_v27 }
  0xa0   : > { %929 = vmatprep.mubr.f32.mxu0 %v275_v28  ;;  %941 = vmatprep.mubr.f32.mxu1 %v283_v29  ;;  %v318_v28 = vld [vmem:[%s1494_s12 + $0x60] sm:$0xff] }
  0xa3   : > { %930 = vmatmul.mubr.f32.gmra.mrb[2].mxu0 %v276_v30  ;;  %942 = vmatmul.mubr.f32.gmra.mrb[2].mxu1 %v284_v31 }
  0xa4   : > { %932 = vmatprep.mubr.f32.mxu0 %v277_v32  ;;  %944 = vmatprep.mubr.f32.mxu1 %v285_v33 }
  0xa7   : > { %933 = vmatmul.mubr.f32.gmra.mrb[4].mxu0 %v278_v34  ;;  %945 = vmatmul.mubr.f32.gmra.mrb[4].mxu1 %v286_v35  ;;  %v313_v35 = vld [vmem:[%s1494_s12 + $0x38] sm:$0xff] }
  0xa8   : > { %935 = vmatprep.mubr.f32.mxu0 %v279_v36  ;;  %947 = vmatprep.mubr.f32.mxu1 %v287_v37  ;;  %v312_v36 = vld [vmem:[%s1494_s12 + $0x30] sm:$0xff] }
  0xab   : > { %936 = vmatmul.mubr.f32.gmra.mrb[6].mxu0 %v280_v38  ;;  %948 = vmatmul.mubr.f32.gmra.mrb[6].mxu1 %v288_v39 }
 0x172   : > { %v928_v51 = vpop.f32.mrb[0].mxu0  ;;  %v940_v52 = vpop.f32.mrb[0].mxu1 }
 0x173   : > { %v394_v54 = vadd.f32 %v928_v51, %v307_v48  ;;  %v434_v55 = vadd.f32 %v940_v52, %v315_v49  ;;  %v388_v56 = vpop.f32.mrb[1].mxu0  ;;  %v428_v57 = vpop.f32.mrb[1].mxu1 }
 0x174   : > { %v389_v60 = vadd.f32 %v388_v56, %v306_v53  ;;  %v429_v6 = vadd.f32 %v428_v57, %v314_v63 }
 0x175   : > { %v1535_v61 = vadd.f32 %v1529_v50, %v434_v55  ;;  %v1538_v62 = vadd.f32 %v1529_v50, %v394_v54 }
 0x176   : > { %v931_v0 = vpop.f32.mrb[2].mxu0  ;;  %v943_v1 = vpop.f32.mrb[2].mxu1  ;;  %v1547_v8 = vadd.f32 %v1529_v50, %v389_v60  ;;  %v479_v20 = vadd.f32 %v1529_v50, %v429_v6 }
 0x177   : > { %v404_v2 = vadd.f32 %v931_v0, %v309_v58  ;;  %505 = vadd.xlane.f32.xlu1 %v1535_v61  ;;  %489 = vadd.xlane.f32.xlu0 %v1538_v62  ;;  %v398_v3 = vpop.f32.mrb[3].mxu0  ;;  %v444_v4 = vadd.f32 %v943_v1, %v317_v59  ;;  %v438_v5 = vpop.f32.mrb[3].mxu1 }
 0x178   : > { %v399_v18 = vadd.f32 %v398_v3, %v308_v9  ;;  %v439_v19 = vadd.f32 %v438_v5, %v316_v10 }
 0x179   : > { %v1544_v7 = vadd.f32 %v1529_v50, %v404_v2  ;;  %v1554_v13 = vadd.f32 %v1529_v50, %v444_v4 }
 0x17a   : > { %v934_v11 = vpop.f32.mrb[4].mxu0  ;;  %v946_v12 = vpop.f32.mrb[4].mxu1  ;;  %v473_v29 = vadd.f32 %v1529_v50, %v399_v18  ;;  %v481_v30 = vadd.f32 %v1529_v50, %v439_v19 }
 0x17b   : > { %493 = vadd.xlane.f32.xlu1 %v1544_v7  ;;  %487 = vadd.xlane.f32.xlu0 %v1547_v8  ;;  %v408_v14 = vpop.f32.mrb[5].mxu0  ;;  %v448_v15 = vpop.f32.mrb[5].mxu1  ;;  %v414_v23 = vadd.f32 %v934_v11, %v311_v16  ;;  %v454_v31 = vadd.f32 %v946_v12, %v319_v25 }
 0x17c   : > { %v409_v24 = vadd.f32 %v408_v14, %v310_v17  ;;  %v449_v32 = vadd.f32 %v448_v15, %v318_v28 }
 0x17d   : > { %v1565_v33 = vadd.f32 %v1529_v50, %v414_v23  ;;  %v1573_v37 = vadd.f32 %v1529_v50, %v454_v31 }
 0x17e   : > { %v937_v21 = vpop.f32.mrb[6].mxu0  ;;  %v949_v22 = vpop.f32.mrb[6].mxu1  ;;  %v1568_v34 = vadd.f32 %v1529_v50, %v409_v24  ;;  %v1578_v40 = vadd.f32 %v1529_v50, %v449_v32 }
 0x17f   : > { %509 = vadd.xlane.f32.xlu1 %v1554_v13  ;;  %503 = vadd.xlane.f32.xlu0 %v479_v20  ;;  %v418_v26 = vpop.f32.mrb[7].mxu0  ;;  %v458_v27 = vpop.f32.mrb[7].mxu1  ;;  %v424_v38 = vadd.f32 %v937_v21, %v313_v35  ;;  %v464_v43 = vadd.f32 %v949_v22, %v321_v41 }
 0x180   : > { %v419_v39 = vadd.f32 %v418_v26, %v312_v36  ;;  %v459_v44 = vadd.f32 %v458_v27, %v320_v42 }
 0x181   : > { %v1585_v47 = vadd.f32 %v1529_v50, %v424_v38  ;;  %v1593_v49 = vadd.f32 %v1529_v50, %v464_v43 }
 0x182   : > { %v1588_v48 = vadd.f32 %v1529_v50, %v419_v39  ;;  %v1596_v51 = vadd.f32 %v1529_v50, %v459_v44 }
 0x183   : > { %491 = vadd.xlane.f32.xlu1 %v473_v29  ;;  %507 = vadd.xlane.f32.xlu0 %v481_v30 }
 0x187   : > { %497 = vadd.xlane.f32.xlu1 %v1565_v33  ;;  %495 = vadd.xlane.f32.xlu0 %v1568_v34 }
 0x18b   : > { %513 = vadd.xlane.f32.xlu1 %v1573_v37  ;;  %511 = vadd.xlane.f32.xlu0 %v1578_v40 }
 0x18f   : > { %501 = vadd.xlane.f32.xlu1 %v1585_v47  ;;  %499 = vadd.xlane.f32.xlu0 %v1588_v48 }
 0x193   : > { %517 = vadd.xlane.f32.xlu1 %v1593_v49  ;;  %515 = vadd.xlane.f32.xlu0 %v1596_v51 }
 0x204   : > { %v506_v52 = vpop.xlane.xlu1 %505  ;;  %v490_v53 = vpop.xlane.xlu0 %489 }
 0x205   : > { %v529_v54 = vmul.f32 0.0078125, %v506_v52  ;;  %v521_v55 = vmul.f32 0.0078125, %v490_v53 }
 0x207   : > { %v1601_v56 = vsub.f32 %v1538_v62, %v521_v55  ;;  %v1604_v59 = vsub.f32 %v1535_v61, %v529_v54 }
 0x208   : > { %v494_v57 = vpop.xlane.xlu1 %493  ;;  %v488_v58 = vpop.xlane.xlu0 %487 }
 0x209   : > { %v523_v60 = vmul.f32 0.0078125, %v494_v57  ;;  %v520_v63 = vmul.f32 0.0078125, %v488_v58  ;;  %v553_v50 = vmul.f32 %v1601_v56, %v1601_v56  ;;  %v561_v61 = vmul.f32 %v1604_v59, %v1604_v59 }
 0x20b   : > { %v1609_v0 = vsub.f32 %v1547_v8, %v520_v63  ;;  %570 = vadd.xlane.f32.xlu1 %v553_v50  ;;  %v1612_v1 = vsub.f32 %v1544_v7, %v523_v60 }
 0x20c   : > { %v510_v2 = vpop.xlane.xlu1 %509  ;;  %v504_v62 = vpop.xlane.xlu0 %503 }
 0x20d   : > { %v531_v3 = vmul.f32 0.0078125, %v510_v2  ;;  %v528_v4 = vmul.f32 0.0078125, %v504_v62  ;;  %v552_v5 = vmul.f32 %v1609_v0, %v1609_v0  ;;  %v555_v7 = vmul.f32 %v1612_v1, %v1612_v1 }
 0x20f   : > { %v1618_v6 = vsub.f32 %v479_v20, %v528_v4  ;;  %586 = vadd.xlane.f32.xlu1 %v561_v61  ;;  %568 = vadd.xlane.f32.xlu0 %v552_v5  ;;  %v1623_v10 = vsub.f32 %v1554_v13, %v531_v3 }
 0x210   : > { %v492_v8 = vpop.xlane.xlu1 %491  ;;  %v508_v9 = vpop.xlane.xlu0 %507 }
 0x211   : > { %v522_v11 = vmul.f32 0.0078125, %v492_v8  ;;  %v530_v12 = vmul.f32 0.0078125, %v508_v9  ;;  %v560_v14 = vmul.f32 %v1618_v6, %v1618_v6  ;;  %v563_v21 = vmul.f32 %v1623_v10, %v1623_v10 }
 0x213   : > { %v1627_v15 = vsub.f32 %v473_v29, %v522_v11  ;;  %574 = vadd.xlane.f32.xlu1 %v555_v7  ;;  %584 = vadd.xlane.f32.xlu0 %v560_v14  ;;  %v1629_v16 = vsub.f32 %v481_v30, %v530_v12 }
 0x214   : > { %v498_v17 = vpop.xlane.xlu1 %497  ;;  %v496_v18 = vpop.xlane.xlu0 %495 }
 0x215   : > { %v525_v19 = vmul.f32 0.0078125, %v498_v17  ;;  %v524_v20 = vmul.f32 0.0078125, %v496_v18  ;;  %v554_v13 = vmul.f32 %v1627_v15, %v1627_v15  ;;  %v562_v25 = vmul.f32 %v1629_v16, %v1629_v16 }
 0x217   : > { %v1636_v22 = vsub.f32 %v1565_v33, %v525_v19  ;;  %590 = vadd.xlane.f32.xlu1 %v563_v21  ;;  %572 = vadd.xlane.f32.xlu0 %v554_v13  ;;  %v1641_v26 = vsub.f32 %v1568_v34, %v524_v20 }
 0x218   : > { %v514_v23 = vpop.xlane.xlu1 %513  ;;  %v512_v24 = vpop.xlane.xlu0 %511 }
 0x219   : > { %v533_v27 = vmul.f32 0.0078125, %v514_v23  ;;  %v532_v28 = vmul.f32 0.0078125, %v512_v24  ;;  %v557_v29 = vmul.f32 %v1636_v22, %v1636_v22  ;;  %v556_v38 = vmul.f32 %v1641_v26, %v1641_v26 }
 0x21b   : > { %v1646_v30 = vsub.f32 %v1573_v37, %v533_v27  ;;  %578 = vadd.xlane.f32.xlu1 %v557_v29  ;;  %588 = vadd.xlane.f32.xlu0 %v562_v25  ;;  %v1649_v31 = vsub.f32 %v1578_v40, %v532_v28 }
 0x21c   : > { %v502_v32 = vpop.xlane.xlu1 %501  ;;  %v500_v33 = vpop.xlane.xlu0 %499 }
 0x21d   : > { %v527_v35 = vmul.f32 0.0078125, %v502_v32  ;;  %v526_v36 = vmul.f32 0.0078125, %v500_v33  ;;  %v565_v34 = vmul.f32 %v1646_v30, %v1646_v30  ;;  %v564_v40 = vmul.f32 %v1649_v31, %v1649_v31 }
 0x21f   : > { %v1656_v39 = vsub.f32 %v1585_v47, %v527_v35  ;;  %594 = vadd.xlane.f32.xlu1 %v565_v34  ;;  %576 = vadd.xlane.f32.xlu0 %v556_v38  ;;  %v1661_v42 = vsub.f32 %v1588_v48, %v526_v36 }
 0x220   : > { %v518_v37 = vpop.xlane.xlu1 %517  ;;  %v516_v41 = vpop.xlane.xlu0 %515 }
 0x221   : > { %v535_v43 = vmul.f32 0.0078125, %v518_v37  ;;  %v534_v44 = vmul.f32 0.0078125, %v516_v41  ;;  %v559_v52 = vmul.f32 %v1656_v39, %v1656_v39  ;;  %v558_v48 = vmul.f32 %v1661_v42, %v1661_v42 }
 0x223   : > { %v1666_v53 = vsub.f32 %v1593_v49, %v535_v43  ;;  %582 = vadd.xlane.f32.xlu1 %v559_v52  ;;  %592 = vadd.xlane.f32.xlu0 %v564_v40  ;;  %v1669_v47 = vsub.f32 %v1596_v51, %v534_v44 }
 0x225   : > { %v567_v54 = vmul.f32 %v1666_v53, %v1666_v53  ;;  %v566_v55 = vmul.f32 %v1669_v47, %v1669_v47 }
 0x227   : > { %598 = vadd.xlane.f32.xlu1 %v567_v54  ;;  %580 = vadd.xlane.f32.xlu0 %v558_v48 }
 0x22b   : > { %596 = vadd.xlane.f32.xlu0 %v566_v55 }
 0x298   : > { %v571_v57 = vpop.xlane.xlu1 %570 }
 0x299   : > { %v601_v49 = vmul.f32 0.0078125, %v571_v57 }
 0x29b   : > { %v617_v58 = vadd.f32 1e-12, %v601_v49 }
 0x29c   : > { %v587_v60 = vpop.xlane.xlu1 %586  ;;  %v569_v63 = vpop.xlane.xlu0 %568 }
 0x29d   : > { %1064 = vrsqrt.f32 %v617_v58  ;;  %v609_v51 = vmul.f32 0.0078125, %v587_v60  ;;  %v600_v50 = vmul.f32 0.0078125, %v569_v63 }
 0x29f   : > { %v625_v2 = vadd.f32 1e-12, %v609_v51  ;;  %v616_v62 = vadd.f32 1e-12, %v600_v50 }
 0x2a0   : > { %v575_v3 = vpop.xlane.xlu1 %574  ;;  %v585_v4 = vpop.xlane.xlu0 %584 }
 0x2a1   : > { %1066 = vrsqrt.f32 %v625_v2  ;;  %v603_v61 = vmul.f32 0.0078125, %v575_v3  ;;  %v608_v5 = vmul.f32 0.0078125, %v585_v4 }
 0x2a2   : > { %1068 = vrsqrt.f32 %v616_v62 }
 0x2a3   : > { %v619_v8 = vadd.f32 1e-12, %v603_v61  ;;  %v624_v9 = vadd.f32 1e-12, %v608_v5 }
 0x2a4   : > { %v591_v7 = vpop.xlane.xlu1 %590  ;;  %v573_v11 = vpop.xlane.xlu0 %572 }
 0x2a5   : > { %1070 = vrsqrt.f32 %v619_v8  ;;  %v611_v12 = vmul.f32 0.0078125, %v591_v7  ;;  %v602_v14 = vmul.f32 0.0078125, %v573_v11 }
 0x2a6   : > { %1072 = vrsqrt.f32 %v624_v9 }
 0x2a7   : > { %v1065_v17 = vpop.eup %1064  ;;  %v627_v18 = vadd.f32 1e-12, %v611_v12  ;;  %v618_v19 = vadd.f32 1e-12, %v602_v14 }
 0x2a8   : > { %v649_v20 = vmul.f32 %v1065_v17, %v1601_v56  ;;  %v579_v21 = vpop.xlane.xlu1 %578  ;;  %v589_v13 = vpop.xlane.xlu0 %588 }
 0x2a9   : > { %1074 = vrsqrt.f32 %v627_v18  ;;  %v605_v23 = vmul.f32 0.0078125, %v579_v21  ;;  %v610_v24 = vmul.f32 0.0078125, %v589_v13 }
 0x2aa   : > { %v669_v25 = vmul.f32 %v1523_v45, %v649_v20  ;;  %1076 = vrsqrt.f32 %v618_v19 }
 0x2ab   : > { %v1067_v27 = vpop.eup %1066  ;;  %v621_v28 = vadd.f32 1e-12, %v605_v23  ;;  %v626_v29 = vadd.f32 1e-12, %v610_v24 }
 0x2ac   : > { %v1069_v32 = vpop.eup %1068  ;;  %v689_v33 = vadd.f32 %v1525_v46, %v669_v25  ;;  %v657_v35 = vmul.f32 %v1067_v27, %v1604_v59  ;;  %v595_v36 = vpop.xlane.xlu1 %594 }
 0x2ad   : > { %v577_v34 = vpop.xlane.xlu0 %576  ;;  %v648_v56 = vmul.f32 %v1069_v32, %v1609_v0  ;;  %1078 = vrsqrt.f32 %v621_v28  ;;  %v613_v38 = vmul.f32 0.0078125, %v595_v36 }
 0x2ae   : > { %v604_v37 = vmul.f32 0.0078125, %v577_v34  ;;  %705 = vst [vmem:[%s1683_s7 + $0x8] sm:$0xff] %v689_v33  ;;  %v677_v41 = vmul.f32 %v1523_v45, %v657_v35  ;;  %1080 = vrsqrt.f32 %v626_v29 }
 0x2af   : > { %v1071_v40 = vpop.eup %1070  ;;  %v668_v43 = vmul.f32 %v1523_v45, %v648_v56  ;;  %v629_v44 = vadd.f32 1e-12, %v613_v38 }
 0x2b0   : > { %v620_v59 = vadd.f32 1e-12, %v604_v37  ;;  %v1073_v52 = vpop.eup %1072  ;;  %v697_v0 = vadd.f32 %v1525_v46, %v677_v41  ;;  %v651_v54 = vmul.f32 %v1071_v40, %v1612_v1  ;;  %v583_v48 = vpop.xlane.xlu1 %582 }
 0x2b1   : > { %v593_v55 = vpop.xlane.xlu0 %592  ;;  %v688_v57 = vadd.f32 %v1525_v46, %v668_v43  ;;  %v656_v49 = vmul.f32 %v1073_v52, %v1618_v6  ;;  %1082 = vrsqrt.f32 %v629_v44  ;;  %v607_v58 = vmul.f32 0.0078125, %v583_v48 }
 0x2b2   : > { %713 = vst [vmem:[%s1683_s7 + $0x48] sm:$0xff] %v697_v0  ;;  %v671_v60 = vmul.f32 %v1523_v45, %v651_v54  ;;  %1084 = vrsqrt.f32 %v620_v59  ;;  %v612_v63 = vmul.f32 0.0078125, %v593_v55 }
 0x2b3   : > { %v1075_v51 = vpop.eup %1074  ;;  %704 = vst [vmem:[%s1683_s7] sm:$0xff] %v688_v57  ;;  %v676_v50 = vmul.f32 %v1523_v45, %v656_v49  ;;  %v623_v2 = vadd.f32 1e-12, %v607_v58 }
 0x2b4   : > { %v1077_v1 = vpop.eup %1076  ;;  %v691_v62 = vadd.f32 %v1525_v46, %v671_v60  ;;  %v659_v3 = vmul.f32 %v1075_v51, %v1623_v10  ;;  %v628_v6 = vadd.f32 1e-12, %v612_v63  ;;  %v599_v4 = vpop.xlane.xlu1 %598 }
 0x2b5   : > { %v581_v61 = vpop.xlane.xlu0 %580  ;;  %v696_v5 = vadd.f32 %v1525_v46, %v676_v50  ;;  %v650_v8 = vmul.f32 %v1077_v1, %v1627_v15  ;;  %1086 = vrsqrt.f32 %v623_v2  ;;  %v615_v9 = vmul.f32 0.0078125, %v599_v4 }
 0x2b6   : > { %707 = vst [vmem:[%s1683_s7 + $0x18] sm:$0xff] %v691_v62  ;;  %v679_v7 = vmul.f32 %v1523_v45, %v659_v3  ;;  %1088 = vrsqrt.f32 %v628_v6  ;;  %v606_v11 = vmul.f32 0.0078125, %v581_v61 }
 0x2b7   : > { %v1079_v12 = vpop.eup %1078  ;;  %712 = vst [vmem:[%s1683_s7 + $0x40] sm:$0xff] %v696_v5  ;;  %v670_v10 = vmul.f32 %v1523_v45, %v650_v8  ;;  %v631_v14 = vadd.f32 1e-12, %v615_v9 }
 0x2b8   : > { %v1081_v17 = vpop.eup %1080  ;;  %v699_v18 = vadd.f32 %v1525_v46, %v679_v7  ;;  %v653_v19 = vmul.f32 %v1079_v12, %v1636_v22  ;;  %v622_v15 = vadd.f32 1e-12, %v606_v11 }
 0x2b9   : > { %v597_v20 = vpop.xlane.xlu0 %596  ;;  %v690_v21 = vadd.f32 %v1525_v46, %v670_v10  ;;  %v658_v13 = vmul.f32 %v1081_v17, %v1629_v16  ;;  %1090 = vrsqrt.f32 %v631_v14 }
 0x2ba   : > { %v614_v23 = vmul.f32 0.0078125, %v597_v20  ;;  %715 = vst [vmem:[%s1683_s7 + $0x58] sm:$0xff] %v699_v18  ;;  %v673_v24 = vmul.f32 %v1523_v45, %v653_v19  ;;  %1092 = vrsqrt.f32 %v622_v15 }
 0x2bb   : > { %v1083_v25 = vpop.eup %1082  ;;  %706 = vst [vmem:[%s1683_s7 + $0x10] sm:$0xff] %v690_v21  ;;  %v678_v27 = vmul.f32 %v1523_v45, %v658_v13 }
 0x2bc   : > { %v630_v28 = vadd.f32 1e-12, %v614_v23  ;;  %v1085_v22 = vpop.eup %1084  ;;  %v693_v29 = vadd.f32 %v1525_v46, %v673_v24  ;;  %v661_v32 = vmul.f32 %v1083_v25, %v1646_v30 }
 0x2bd   : > { %v698_v16 = vadd.f32 %v1525_v46, %v678_v27  ;;  %v652_v33 = vmul.f32 %v1085_v22, %v1641_v26 }
 0x2be   : > { %1094 = vrsqrt.f32 %v630_v28  ;;  %709 = vst [vmem:[%s1683_s7 + $0x28] sm:$0xff] %v693_v29  ;;  %v681_v35 = vmul.f32 %v1523_v45, %v661_v32 }
 0x2bf   : > { %v1087_v36 = vpop.eup %1086  ;;  %714 = vst [vmem:[%s1683_s7 + $0x50] sm:$0xff] %v698_v16  ;;  %v672_v34 = vmul.f32 %v1523_v45, %v652_v33 }
 0x2c0   : > { %v1089_v56 = vpop.eup %1088  ;;  %v701_v38 = vadd.f32 %v1525_v46, %v681_v35  ;;  %v655_v37 = vmul.f32 %v1087_v36, %v1656_v39 }
 0x2c1   : > { %v692_v30 = vadd.f32 %v1525_v46, %v672_v34  ;;  %v660_v41 = vmul.f32 %v1089_v56, %v1649_v31 }
 0x2c2   : > { %717 = vst [vmem:[%s1683_s7 + $0x68] sm:$0xff] %v701_v38  ;;  %v675_v26 = vmul.f32 %v1523_v45, %v655_v37 }
 0x2c3   : > { %v1091_v40 = vpop.eup %1090  ;;  %708 = vst [vmem:[%s1683_s7 + $0x20] sm:$0xff] %v692_v30  ;;  %v680_v43 = vmul.f32 %v1523_v45, %v660_v41 }
 0x2c4   : > { %v1093_v44 = vpop.eup %1092  ;;  %v695_v59 = vadd.f32 %v1525_v46, %v675_v26  ;;  %v663_v39 = vmul.f32 %v1091_v40, %v1666_v53 }
 0x2c5   : > { %v700_v52 = vadd.f32 %v1525_v46, %v680_v43  ;;  %v654_v31 = vmul.f32 %v1093_v44, %v1661_v42 }
 0x2c6   : > { %711 = vst [vmem:[%s1683_s7 + $0x38] sm:$0xff] %v695_v59  ;;  %v683_v0 = vmul.f32 %v1523_v45, %v663_v39 }
 0x2c7   : > { %716 = vst [vmem:[%s1683_s7 + $0x60] sm:$0xff] %v700_v52  ;;  %v674_v48 = vmul.f32 %v1523_v45, %v654_v31 }
 0x2c8   : > { %v1095_v54 = vpop.eup %1094  ;;  %v703_v55 = vadd.f32 %v1525_v46, %v683_v0 }
 0x2c9   : > { %v662_v57 = vmul.f32 %v1095_v54, %v1669_v47  ;;  %v694_v53 = vadd.f32 %v1525_v46, %v674_v48 }
 0x2ca   : > { %719 = vst [vmem:[%s1683_s7 + $0x78] sm:$0xff] %v703_v55 }
 0x2cb   : > { %v682_v42 = vmul.f32 %v1523_v45, %v662_v57  ;;  %710 = vst [vmem:[%s1683_s7 + $0x30] sm:$0xff] %v694_v53 }
 0x2cd   : > { %v702_v47 = vadd.f32 %v1525_v46, %v682_v42 }
 0x2cf   : > { %718 = vst [vmem:[%s1683_s7 + $0x70] sm:$0xff] %v702_v47 }
 0x2d0   : > { %1197 = shalt.err (!%p1194_p6)
}
 0x2d1   : > { %s1198_s0 = scalar_lea.hbm %s1747_s10, 2048  ;;  %s1202_s11 = scalar_lea.hbm %s1799_s4, 4096 }
 0x2d2   : > { %p1199_p8 = scmp.ne.s32.totalorder %s1747_s10, %s1198_s0  ;;  %p1203_p4 = scmp.lt.u32.totalorder %s1747_s10, %s1799_s4 }
 0x2d3   : > { %p1204_p11 = scmp.lt.u32.totalorder %s1202_s11, %s1198_s0  ;;  %p1206_p3 = scmp.lt.u32.totalorder %s1198_s0, %s1747_s10 }
 0x2d4   : > { %p1200_p10 = pnand %p1199_p8, %p1387_p12 }
 0x2d5   : > { %p1205_p13 = por %p1204_p11, %p1203_p4 }
 0x2d6   : > { %p1201_p0 = pneg %p1200_p10 }
 0x2d7   : > { %p1207_p7 = por %p1206_p3, %p1205_p13 }
 0x2d9   : > { %p1208_p9 = pnand %p1207_p7, %p1201_p0 }
 0x2db   : > { %1211 = shalt.err (!%p1208_p9)
}
 0x2dc   : > { %s1266_s12 = smov 128   ;;  %s1267_s21 = smov 8  }
 0x2dd   : > { %1006 = dma.vmem_to_hbm [thread:$0]  (%p1387_p12), %s1749_s28, 2048, %s1747_s10, %s721_s19, %s1266_s12, %s1266_s12, %s1267_s21  }
 0x2de PF: > { %s749_s13 = sand.u32 1, %s1246_s15   ;;  %p1825_p1 = scmp.ne.s32.totalorder %s1810_s22, 0 }
 0x2df   : > { %p1826_p5 = scmp.ge.s32.totalorder %s1258_s18, 2  ;;  %s750_s7 = scalar_lea.sflag [#allocation4], %s749_s13 }
 0x2e1   : > { %p1020_p2 = pnand %p1826_p5, %p1825_p1 }
 0x2e3   : > { %1241 = dma.done.wait (!%p1020_p2), %s750_s7, 2048  }
 0x2e4   : > { %1243 = vsyncadd (!%p1020_p2), %s750_s7, 4294965248  ;;  %s1827_s8 = sld [smem:[#allocation13_spill]]  ;;  %p20_p6 = scmp.ge.s32.totalorder %s1349_s27, 4  }
 0x2e5   : > { %s1828_s15 = smov %s1250_s16  ;;  %s1829_s16 = smov %s1254_s17 }
 0x2e6   : > { %s1831_s18 = smov %s1349_s27  ;;  %22 = sbr.rel (!%p20_p6) target bundleno = 10 (0xa), region = 98 }
 0x2ea   : > { %s1830_s17 = smov %s1827_s8 }
 0x2ed   :  { %755 = vsyncpa [#allocation3], 1 }
 0x2ee   :  { %757 = vsyncpa [#allocation3 + $0x1], 1 }
 0x2ef   :  { %758 = vsyncpa [#allocation6], 1 }
 0x2f0   :  { %760 = vsyncpa [#allocation6 + $0x1], 1 }
 0x2f1   :  { %761 = vsyncpa [#allocation4], 1 }
 0x2f2   :  { %763 = vsyncpa [#allocation4 + $0x1], 1 }

</bundles_post_ra>
